<compile_context>
chip_gen: v5e
topology: v5e:2x2
jax: 0.10.0
libtpu: 0.0.40
codegen_flags: <defaults>
</compile_context>

<pallas_src>
import functools

import jax
import jax.numpy as jnp
from jax.experimental import pallas as pl
from jax.experimental.pallas import tpu as pltpu


def _round_up(x, m):
    return (x + m - 1) // m * m


def image_encoder_kernel(x_ref, w1_ref, b1_ref, w2_ref, b2_ref, o_ref):
    # x_ref:  (tb, pd_p)   bf16  mean-pooled patch features per batch element
    # w1_ref: (pd_p, D_p)  bf16  WSI-encoder patch-embedding weight
    # b1_ref: (1, D_p)     f32
    # w2_ref: (D_p, E_p)   bf16  embed_convert (nn.Linear) weight
    # b2_ref: (1, E_p)     f32
    # o_ref:  (tb, E_p)    f32
    # CLS embedding: one lane-dense bf16 MXU matmul with f32 accumulation + f32 bias.
    cls = jnp.dot(x_ref[...], w1_ref[...],
                  preferred_element_type=jnp.float32) + b1_ref[...]     # (tb, D_p)
    # embed_convert: (tb, D_p) @ (D_p, E_p), f32 accumulation, f32 bias.
    out = jnp.dot(cls.astype(w2_ref.dtype), w2_ref[...],
                  preferred_element_type=jnp.float32) + b2_ref[...]     # (tb, E_p)
    o_ref[...] = out.astype(o_ref.dtype)


def image_encoder(images, params, patch=4):
    """images: float32 [B, C, H, W] (NCHW, matching PyTorch)."""
    w1, b1, w2, b2 = params
    B, C, H, W = images.shape
    ph = pw = patch
    patch_dim = C * ph * pw
    D = w1.shape[1]   # WSI encoder embed_dim
    E = w2.shape[1]   # embed_size

    # Mean-pool over patch positions BEFORE the (linear) patch embedding.  This is exactly
    # mean_p over the (C, ph, pw)-ordered patch vectors, so no transpose is materialized.
    x_mean = images.reshape(B, C, H // ph, ph, W // pw, pw).mean(axis=(2, 4))
    x_mean = x_mean.reshape(B, patch_dim)                                # f32 (B, patch_dim)

    # Lane-/sublane-friendly padded sizes (128-multiples: native v5e MXU tile; see TODO above
    # for 256-multiples at production dims on v6e/v7x).
    pd_p = _round_up(patch_dim, 128)
    D_p = _round_up(D, 128)
    E_p = _round_up(E, 128)
    B_p = _round_up(B, 8)
    tb = min(B_p, 128)           # batch tile (one sublane-aligned block per grid step)
    B_p = _round_up(B_p, tb)
    n_tiles = B_p // tb

    # Zero-pad + bf16 cast (single jnp.pad each; zero padding keeps padded rows/cols exactly
    # zero in the matmuls, so slicing them off at the end is lossless).
    x_p = jnp.pad(x_mean.astype(jnp.bfloat16),
                  ((0, B_p - B), (0, pd_p - patch_dim)))
    w1_p = jnp.pad(w1.astype(jnp.bfloat16),
                   ((0, pd_p - patch_dim), (0, D_p - D)))
    b1_p = jnp.pad(b1.astype(jnp.float32), ((0, 0), (0, D_p - D)))
    w2_p = jnp.pad(w2.astype(jnp.bfloat16), ((0, D_p - D), (0, E_p - E)))
    b2_p = jnp.pad(b2.astype(jnp.float32), ((0, 0), (0, E_p - E)))

    cost = pl.CostEstimate(
        flops=2 * B_p * pd_p * D_p + 2 * B_p * D_p * E_p,
        transcendentals=0,
        bytes_accessed=(x_p.size * 2 + w1_p.size * 2 + w2_p.size * 2
                        + b1_p.size * 4 + b2_p.size * 4 + B_p * E_p * 4),
    )

    out = pl.pallas_call(
        image_encoder_kernel,
        out_shape=jax.ShapeDtypeStruct((B_p, E_p), jnp.float32),
        grid_spec=pltpu.PrefetchScalarGridSpec(
            num_scalar_prefetch=0,
            grid=(n_tiles,),
            in_specs=[
                pl.BlockSpec((tb, pd_p), lambda i: (i, 0)),      # batch-tiled input
                pl.BlockSpec((pd_p, D_p), lambda i: (0, 0)),     # resident weights
                pl.BlockSpec((1, D_p), lambda i: (0, 0)),
                pl.BlockSpec((D_p, E_p), lambda i: (0, 0)),
                pl.BlockSpec((1, E_p), lambda i: (0, 0)),
            ],
            out_specs=pl.BlockSpec((tb, E_p), lambda i: (i, 0)),
        ),
        compiler_params=pltpu.CompilerParams(
            dimension_semantics=("parallel",)),
        cost_estimate=cost,
    )(x_p, w1_p, b1_p, w2_p, b2_p)

    return out[:B, :E]


def make_params(key, patch_dim, embed_dim, embed_size):
    k1, k2, k3, k4 = jax.random.split(key, 4)
    # synthetic WSI encoder (patch embedding) params
    w1 = jax.random.normal(k1, (patch_dim, embed_dim), jnp.float32) * 0.02
    b1 = jax.random.normal(k2, (1, embed_dim), jnp.float32) * 0.02
    # embed_convert: nn.Linear(embed_dim, embed_size)  (embed_dim != embed_size -> Linear)
    w2 = jax.random.normal(k3, (embed_dim, embed_size), jnp.float32) * 0.02
    b2 = jax.random.normal(k4, (1, embed_size), jnp.float32) * 0.02
    return w1, b1, w2, b2


if __name__ == "__main__":
    # Small shapes consistent with the module's forward.
    B, C, H, W = 2, 4, 16, 16
    patch = 4
    embed_dim = 32    # WSI_Encoder.embed_dim
    embed_size = 64   # target embed size (!= embed_dim so the Linear path is exercised)
    patch_dim = C * patch * patch
    P = (H // patch) * (W // patch)

    key = jax.random.PRNGKey(0)
    kx, kp = jax.random.split(key)
    images = jax.random.normal(kx, (B, C, H, W), jnp.float32)
    params = make_params(kp, patch_dim, embed_dim, embed_size)

    out = image_encoder(images, params, patch=patch)
    out = jax.block_until_ready(out)

    # Reference in plain JAX.  Mean-pool hoisted identically (the synthetic patch embedding is
    # linear, so mean_p(X) @ W1 + b1 == mean_p(X @ W1 + b1)); bf16 rounding applied to the
    # matmul operands so the comparison isolates kernel correctness from bf16 quantization.
    w1, b1, w2, b2 = params
    xr = images.reshape(B, C, H // patch, patch, W // patch, patch)
    xr = xr.transpose(0, 2, 4, 1, 3, 5).reshape(B, P, patch_dim)
    x_mean_ref = jnp.mean(xr, axis=1)                                    # f32 (B, patch_dim)
    rnd = lambda a: a.astype(jnp.bfloat16).astype(jnp.float32)
    cls_ref = rnd(x_mean_ref) @ rnd(w1) + b1
    ref = rnd(cls_ref) @ rnd(w2) + b2

    assert out.shape == (B, embed_size)
    assert jnp.allclose(out, ref, atol=1e-4, rtol=1e-3), \
        float(jnp.max(jnp.abs(out - ref)))

    print("KERNEL_OK")
</pallas_src>

<mosaic_0001>
module attributes {stable_mosaic.version = 11 : i64} {
  func.func @image_encoder_kernel(%arg0: i32, %arg1: memref<8x128xbf16, #tpu.memory_space<vmem>>, %arg2: memref<128x128xbf16, #tpu.memory_space<vmem>>, %arg3: memref<1x128xf32, #tpu.memory_space<vmem>>, %arg4: memref<128x128xbf16, #tpu.memory_space<vmem>>, %arg5: memref<1x128xf32, #tpu.memory_space<vmem>>, %arg6: memref<8x128xf32, #tpu.memory_space<vmem>>) attributes {dimension_semantics = [#tpu.dimension_semantics<parallel>], iteration_bounds = array<i64: 1>, scalar_prefetch = 0 : i64, scratch_operands = 0 : i64, tpu.core_type = #tpu.core_type<tc>, window_params = [{transform_indices = @transform_0, window_bounds = array<i64: 8, 128>}, {pipeline_mode = #tpu.pipeline_mode<synchronous>, transform_indices = @transform_1, window_bounds = array<i64: 128, 128>}, {pipeline_mode = #tpu.pipeline_mode<synchronous>, transform_indices = @transform_2, window_bounds = array<i64: 1, 128>}, {pipeline_mode = #tpu.pipeline_mode<synchronous>, transform_indices = @transform_3, window_bounds = array<i64: 128, 128>}, {pipeline_mode = #tpu.pipeline_mode<synchronous>, transform_indices = @transform_4, window_bounds = array<i64: 1, 128>}, {transform_indices = @transform_5, window_bounds = array<i64: 8, 128>}]} {
    %c0 = arith.constant 0 : index
    %c0_0 = arith.constant 0 : index
    %0 = vector.load %arg1[%c0, %c0_0] : memref<8x128xbf16, #tpu.memory_space<vmem>>, vector<8x128xbf16>
    %c0_1 = arith.constant 0 : index
    %c0_2 = arith.constant 0 : index
    %1 = vector.load %arg2[%c0_1, %c0_2] : memref<128x128xbf16, #tpu.memory_space<vmem>>, vector<128x128xbf16>
    %cst = arith.constant dense<0.000000e+00> : vector<8x128xf32>
    %2 = tpu.matmul %0, %1, %cst {dimension_numbers = #tpu.dot_dimension_numbers<[1], [0], [0], [1], [0, 0, 1, 1], [], []>} : vector<8x128xbf16>, vector<128x128xbf16>, vector<8x128xf32> -> vector<8x128xf32>
    %c0_3 = arith.constant 0 : index
    %c0_4 = arith.constant 0 : index
    %3 = vector.load %arg3[%c0_3, %c0_4] : memref<1x128xf32, #tpu.memory_space<vmem>>, vector<1x128xf32>
    %4 = vector.broadcast %3 : vector<1x128xf32> to vector<8x128xf32>
    %5 = arith.addf %2, %4 : vector<8x128xf32>
    %6 = arith.truncf %5 : vector<8x128xf32> to vector<8x128xbf16>
    %c0_5 = arith.constant 0 : index
    %c0_6 = arith.constant 0 : index
    %7 = vector.load %arg4[%c0_5, %c0_6] : memref<128x128xbf16, #tpu.memory_space<vmem>>, vector<128x128xbf16>
    %cst_7 = arith.constant dense<0.000000e+00> : vector<8x128xf32>
    %8 = tpu.matmul %6, %7, %cst_7 {dimension_numbers = #tpu.dot_dimension_numbers<[1], [0], [0], [1], [0, 0, 1, 1], [], []>} : vector<8x128xbf16>, vector<128x128xbf16>, vector<8x128xf32> -> vector<8x128xf32>
    %c0_8 = arith.constant 0 : index
    %c0_9 = arith.constant 0 : index
    %9 = vector.load %arg5[%c0_8, %c0_9] : memref<1x128xf32, #tpu.memory_space<vmem>>, vector<1x128xf32>
    %10 = vector.broadcast %9 : vector<1x128xf32> to vector<8x128xf32>
    %11 = arith.addf %8, %10 : vector<8x128xf32>
    %c0_10 = arith.constant 0 : index
    %c0_11 = arith.constant 0 : index
    %12 = vector.load %arg6[%c0_10, %c0_11] : memref<8x128xf32, #tpu.memory_space<vmem>>, vector<8x128xf32>
    tpu.vector_store %arg6[%c0_10, %c0_11], %11 {strides = array<i32>} : memref<8x128xf32, #tpu.memory_space<vmem>>, vector<8x128xf32>,
    return
  }
  func.func @transform_0(%arg0: i32) -> (i32, i32) {
    %c0_i32 = arith.constant 0 : i32
    %c0_i32_0 = arith.constant 0 : i32
    return %arg0, %c0_i32 : i32, i32
  }
  func.func @transform_1(%arg0: i32) -> (i32, i32) {
    %c0_i32 = arith.constant 0 : i32
    %c0_i32_0 = arith.constant 0 : i32
    %c0_i32_1 = arith.constant 0 : i32
    return %c0_i32, %c0_i32_0 : i32, i32
  }
  func.func @transform_2(%arg0: i32) -> (i32, i32) {
    %c0_i32 = arith.constant 0 : i32
    %c0_i32_0 = arith.constant 0 : i32
    %c0_i32_1 = arith.constant 0 : i32
    return %c0_i32, %c0_i32_0 : i32, i32
  }
  func.func @transform_3(%arg0: i32) -> (i32, i32) {
    %c0_i32 = arith.constant 0 : i32
    %c0_i32_0 = arith.constant 0 : i32
    %c0_i32_1 = arith.constant 0 : i32
    return %c0_i32, %c0_i32_0 : i32, i32
  }
  func.func @transform_4(%arg0: i32) -> (i32, i32) {
    %c0_i32 = arith.constant 0 : i32
    %c0_i32_0 = arith.constant 0 : i32
    %c0_i32_1 = arith.constant 0 : i32
    return %c0_i32, %c0_i32_0 : i32, i32
  }
  func.func @transform_5(%arg0: i32) -> (i32, i32) {
    %c0_i32 = arith.constant 0 : i32
    %c0_i32_0 = arith.constant 0 : i32
    return %arg0, %c0_i32 : i32, i32
  }
}

</mosaic_0001>

<bundles_post_ra>
// kernel: tpu_custom_call.1
= control target key start
LH: loop header
LB: loop body
LE: loop exit
PB: predicated region body
PF: predicated region fallthrough
CT: control target
= control target key end

     0   :  { %10 = vsyncpa [#allocation3], 0  ;;  %s493_s0 = inlined_call_operand.hbm [shape: bf16[8,128], index: 0, kind: input, shape index: {}]   ;;  %s494_s1 = inlined_call_operand.hbm [shape: bf16[128,128], index: 1, kind: input, shape index: {}]   ;;  %s495_s2 = inlined_call_operand.vmem [shape: f32[1,128], index: 2, kind: input, shape index: {}]   ;;  %s496_s3 = inlined_call_operand.hbm [shape: bf16[128,128], index: 3, kind: input, shape index: {}]   ;;  %s497_s4 = inlined_call_operand.vmem [shape: f32[1,128], index: 4, kind: input, shape index: {}]   ;;  %s498_s5 = inlined_call_operand.hbm [shape: f32[8,128], index: 5, kind: output, shape index: {}]  }
   0x1   :  { %11 = vsyncpa [#allocation6], 0  ;;  %s28_s20 = sshll.u32 %s494_s1, 4  ;;  %s29_s20 = int_to_ptr.hbm [resolvable:$true] %s28_s20 }
   0x2   :  { %12 = vsyncpa [#allocation4], 0  ;;  %s439_s21 = smov [#allocation5]   ;;  %s18_s25 = sshll.u32 %s493_s0, 4  ;;  %s19_s25 = int_to_ptr.hbm [resolvable:$true] %s18_s25 }
   0x3   :  { %s30_s22 = sshll.u32 %s439_s21, 4  ;;  %s440_s26 = smov 64   ;;  %s31_s22 = int_to_ptr.vmem [resolvable:$true] %s30_s22 }
   0x4   :  { %s441_s27 = smov 4   ;;  %s442_s28 = smov [#allocation2]  }
   0x5   :  { %36 = dma.hbm_to_vmem [thread:$0]  %s29_s20, 1024, %s31_s22, [#allocation6], %s440_s26, %s440_s26, %s441_s27  }
   0x6   :  { %s20_s29 = sshll.u32 %s442_s28, 4  ;;  %s43_s7 = sshll.u32 %s496_s3, 4  ;;  %s21_s29 = int_to_ptr.vmem [resolvable:$true] %s20_s29  ;;  %s44_s7 = int_to_ptr.hbm [resolvable:$true] %s43_s7 }
   0x7   :  { %23 = dma.hbm_to_vmem [thread:$0]  %s19_s25, 64, %s21_s29, [#allocation3]  }
   0x8   :  { %s443_s1 = smov [#allocation7]  }
   0x9   :  { %s45_s8 = sshll.u32 %s443_s1, 4  ;;  %s46_s8 = int_to_ptr.vmem [resolvable:$true] %s45_s8 }
   0xa   :  { %51 = dma.hbm_to_vmem [thread:$0]  %s44_s7, 1024, %s46_s8, [#allocation6], %s440_s26, %s440_s26, %s441_s27  }
   0xb   :  { %433 = dma.done.wait [#allocation3], 64  }
   0xc   :  { %434 = vsyncadd [#allocation3], 4294967232 }
   0xd   :  { %435 = dma.done.wait [#allocation6], 2048  }
   0xe   :  { %436 = vsyncadd [#allocation6], 4294965248  ;;  %v320_v0 = vld [vmem:[#allocation5 + $0x38] sm:$0xff]  ;;  %v319_v1 = vld [vmem:[#allocation5 + $0x30] sm:$0xff]  ;;  %s444_s11 = smov [#allocation8]   ;;  %s238_s15 = sshll.u32 %s498_s5, 4  ;;  %s239_s15 = int_to_ptr.hbm [resolvable:$true] %s238_s15 }
   0xf   :  { %135 = vmatpush.bf16.msra.mxu0 %v320_v0  ;;  %v328_v2 = vld [vmem:[#allocation7 + $0x38] sm:$0xff]  ;;  %v327_v3 = vld [vmem:[#allocation7 + $0x30] sm:$0xff]  ;;  %v318_v4 = vld [vmem:[#allocation5 + $0x28] sm:$0xff]  ;;  %s236_s12 = sshll.u32 %s444_s11, 4  ;;  %s237_s12 = int_to_ptr.vmem [resolvable:$true] %s236_s12 }
  0x10   :  { %217 = vmatpush.bf16.msra.mxu1 %v328_v2  ;;  %v326_v5 = vld [vmem:[#allocation7 + $0x28] sm:$0xff]  ;;  %v317_v6 = vld [vmem:[#allocation5 + $0x20] sm:$0xff]  ;;  %v316_v8 = vld [vmem:[#allocation5 + $0x18] sm:$0xff] }
  0x11   :  { %v325_v7 = vld [vmem:[#allocation7 + $0x20] sm:$0xff]  ;;  %v324_v9 = vld [vmem:[#allocation7 + $0x18] sm:$0xff]  ;;  %v315_v10 = vld [vmem:[#allocation5 + $0x10] sm:$0xff] }
  0x12   :  { %v323_v11 = vld [vmem:[#allocation7 + $0x10] sm:$0xff]  ;;  %v314_v12 = vld [vmem:[#allocation5 + $0x8] sm:$0xff]  ;;  %v313_v14 = vld [vmem:[#allocation5] sm:$0xff] }
  0x13   :  { %136 = vmatpush.bf16.msra.mxu0 %v319_v1  ;;  %v322_v13 = vld [vmem:[#allocation7 + $0x8] sm:$0xff]  ;;  %v66_v15 = vld [vmem:[#allocation2] sm:$0xf]  ;;  %v321_v16 = vld [vmem:[#allocation7] sm:$0xff] }
  0x14   :  { %218 = vmatpush.bf16.msra.mxu1 %v327_v3  ;;  %v335_v17 = vld [vmem:[%s495_s2] ss:$0 sm:$0xff] }
  0x15   :  { %v336_v22 = vld [vmem:[%s497_s4] ss:$0 sm:$0xff] }
  0x17   :  { %137 = vmatpush.bf16.msra.mxu0 %v318_v4 }
  0x18   :  { %219 = vmatpush.bf16.msra.mxu1 %v326_v5 }
  0x1b   :  { %138 = vmatpush.bf16.msra.mxu0 %v317_v6 }
  0x1c   :  { %220 = vmatpush.bf16.msra.mxu1 %v325_v7 }
  0x1f   :  { %139 = vmatpush.bf16.msra.mxu0 %v316_v8 }
  0x20   :  { %221 = vmatpush.bf16.msra.mxu1 %v324_v9 }
  0x23   :  { %140 = vmatpush.bf16.msra.mxu0 %v315_v10 }
  0x24   :  { %222 = vmatpush.bf16.msra.mxu1 %v323_v11 }
  0x27   :  { %141 = vmatpush.bf16.msra.mxu0 %v314_v12 }
  0x28   :  { %223 = vmatpush.bf16.msra.mxu1 %v322_v13 }
  0x2b   :  { %142 = vmatpush.bf16.msra.mxu0 %v313_v14 }
  0x2c   :  { %224 = vmatpush.bf16.msra.mxu1 %v321_v16 }
  0x2e   :  { %143 = vmatmul.bf16.vlgmr.msra.gmra.mxu0 %v66_v15 }
  0xab   :  { %v144_v18 = vpop.f32.mrf.mxu0 }
  0xac   :  { %v145_v19 = vadd.f32 %v335_v17, %v144_v18 }
  0xae   :  { %v148_v20 = vpack.c.bf16 %v145_v19, %v145_v19 }
  0xb0   :  { %225 = vmatmul.bf16.vlgmr.msra.gmra.mxu1 %v148_v20 }
  0xb3   :  { %v146_v21 = vpop.f32.mrf.mxu0 }
 0x12d   :  { %v226_v23 = vpop.f32.mrf.mxu1 }
 0x12e   :  { %v227_v24 = vadd.f32 %v336_v22, %v226_v23 }
 0x130   :  { %230 = vst [vmem:[#allocation8] sm:$0xff] %v227_v24 }
 0x131   :  { %241 = dma.vmem_to_hbm [thread:$0]  %s237_s12, 128, %s239_s15, [#allocation4]  }
 0x135   :  { %v228_v25 = vpop.f32.mrf.mxu1 }
 0x136   :  { %437 = dma.done.wait [#allocation4], 128  }
 0x137   :  { %438 = vsyncadd [#allocation4], 4294967168 }
 0x138   :  { %246 = vsyncpa [#allocation3], 1 }
 0x139   :  { %247 = vsyncpa [#allocation6], 1 }
 0x13a   :  { %248 = vsyncpa [#allocation4], 1 }

</bundles_post_ra>
